<compile_context>
chip_gen: v6e
topology: v6e:2x2x1
jax: 0.10.0
libtpu: 0.0.40
codegen_flags: <defaults>
</compile_context>

<pallas_src>
import jax
import jax.numpy as jnp
from jax.experimental import pallas as pl
from jax.experimental.pallas import tpu as pltpu


# ----------------------------- parameter setup (glue) -----------------------
def phi(rt, ri, distance="medium"):
    rt = rt.astype(jnp.float32)
    if distance == "small":
        return jnp.abs(rt - ri)
    elif distance == "large":
        return 2.0 * jnp.square(rt - ri)
    else:
        return jnp.square(rt - ri)


def soft_label(total_label_num, target_index_range, distance):
    lo, hi = target_index_range
    length = hi - lo + 1
    w = jax.nn.softmax(
        -phi(jnp.arange(length)[:, None], jnp.arange(length), distance), axis=0
    )
    out = jnp.zeros((total_label_num, total_label_num), dtype=jnp.float32)
    out = out.at[lo : hi + 1, lo : hi + 1].set(w)
    return out


# --------------------------------- kernel -----------------------------------
def ordinal_loss_kernel(tgt_ref, x_ref, w_ref, o_ref):
    # tgt_ref : VMEM (Tn, 1)     int32  targets tile
    # x_ref   : VMEM (Tn, V)     f32    logits tile (auto double-buffered)
    # w_ref   : VMEM (V, V)      f32    soft-label matrix (resident, constant index)
    # o_ref   : VMEM (1, 8, 128) f32    per-tile partial-sum slab (full aligned tile)
    x = x_ref[...]
    tile_n, v = x.shape

    # One-hot gather of the needed weight rows on the (otherwise idle) MXU.
    col = jax.lax.broadcasted_iota(jnp.int32, (tile_n, v), 1)
    onehot = (col == tgt_ref[...]).astype(jnp.float32)              # (Tn, V)
    w_rows = jnp.dot(onehot, w_ref[...], preferred_element_type=jnp.float32)

    # log-sum-exp of the logits tile.
    m = jnp.max(x, axis=1, keepdims=True)
    lse = jnp.log(jnp.sum(jnp.exp(x - m), axis=1, keepdims=True)) + m  # (Tn, 1)

    # loss_row = sum_v( -w_row * log_softmax(x) ) = sum_v( w_row * (lse - x) )
    # (single fused reduction; logsoftmax never materialized)
    tile_sum = jnp.sum(w_rows * (lse - x))

    # Full-tile, lane-dense, unmasked store; wrapper reads element [0, 0].
    o_ref[...] = jnp.full(o_ref.shape, tile_sum, dtype=o_ref.dtype)


# --------------------------------- wrapper -----------------------------------
def ordinal_loss(x, target, weights, tile_n=None):
    n, v = x.shape
    assert weights.shape == (v, v)

    # Resident-weights strategy assumes (V, V) f32 fits comfortably in VMEM.
    # TODO(synk): for very large vocab (V*V*4 >> ~24 MiB) fall back to a
    # single-semaphore DMA row-gather of weight rows instead.
    assert v * v * 4 <= 24 * 1024 * 1024, "vocab too large for resident weights"

    if tile_n is None:
        # Target ~2 MiB x tiles (multiple of 8 rows); pick a divisor of n.
        cap = max(8, ((2 << 20) // (v * 4)) // 8 * 8)
        if n <= cap:
            tile_n = n
        else:
            tile_n = n  # fallback: single tile
            for cand in range(cap, 7, -8):
                if n % cand == 0:
                    tile_n = cand
                    break
    # TODO(synk): pad/mask remainder tiles instead of requiring divisibility.
    assert n % tile_n == 0, "batch size must be divisible by tile_n"
    assert tile_n == n or tile_n % 8 == 0, "tile_n must be a multiple of 8"
    num_tiles = n // tile_n

    tgt = target.astype(jnp.int32).reshape(n, 1)

    grid_spec = pltpu.PrefetchScalarGridSpec(
        num_scalar_prefetch=0,
        grid=(num_tiles,),
        in_specs=[
            pl.BlockSpec((tile_n, 1), lambda i: (i, 0)),  # targets tile
            pl.BlockSpec((tile_n, v), lambda i: (i, 0)),  # logits tile
            pl.BlockSpec((v, v), lambda i: (0, 0)),       # weights, resident
        ],
        out_specs=pl.BlockSpec((1, 8, 128), lambda i: (i, 0, 0)),
    )

    # VMEM budget: resident weights + double-buffered x/tgt tiles + out slabs.
    vmem_needed = 4 * (2 * v * v + 2 * tile_n * v + 2 * tile_n + 2 * 8 * 128)
    vmem_limit = min(max(vmem_needed + (8 << 20), 32 << 20), 48 << 20)

    cost = pl.CostEstimate(
        flops=2 * n * v * v + 6 * n * v,
        transcendentals=n * v + n,
        bytes_accessed=n * v * 4 + v * v * 4 + n * 4 + num_tiles * 8 * 128 * 4,
    )

    partials = pl.pallas_call(
        ordinal_loss_kernel,
        out_shape=jax.ShapeDtypeStruct((num_tiles, 8, 128), jnp.float32),
        grid_spec=grid_spec,
        compiler_params=pltpu.CompilerParams(
            dimension_semantics=("parallel",),
            vmem_limit_bytes=vmem_limit,
        ),
        cost_estimate=cost,
    )(tgt, x, weights)

    # Global batch mean in the wrapper (global n, not per-tile n).
    return jnp.sum(partials[:, 0, 0]) * (1.0 / n)


# ------------------------------- reference -----------------------------------
def ordinal_loss_ref(x, target, weights):
    logsm = jax.nn.log_softmax(x, axis=1)
    target_array = -weights[target]
    return jnp.mean(jnp.sum(logsm * target_array, axis=1))


if __name__ == "__main__":
    N, V = 32, 128
    target_index_range = (10, 40)
    distance = "medium"

    weights = soft_label(V, target_index_range, distance)

    key = jax.random.PRNGKey(0)
    kx, kt = jax.random.split(key)
    x = jax.random.normal(kx, (N, V), dtype=jnp.float32)
    target = jax.random.randint(
        kt, (N,), target_index_range[0], target_index_range[1] + 1, dtype=jnp.int32
    )

    ref = ordinal_loss_ref(x, target, weights)

    # Multi-tile path (grid of 4 batch tiles, exercises the pipeline + partials).
    loss_multi = ordinal_loss(x, target, weights, tile_n=8)
    # Default auto tile sizing (single large tile at this small N).
    loss_auto = ordinal_loss(x, target, weights)
    jax.block_until_ready((loss_multi, loss_auto))

    assert jnp.allclose(loss_multi, ref, atol=1e-5, rtol=1e-5), (loss_multi, ref)
    assert jnp.allclose(loss_auto, ref, atol=1e-5, rtol=1e-5), (loss_auto, ref)
    print("KERNEL_OK")
</pallas_src>

<mosaic_0001>
module attributes {stable_mosaic.version = 11 : i64} {
  func.func @ordinal_loss_kernel(%arg0: i32, %arg1: memref<8x1xi32, #tpu.memory_space<vmem>>, %arg2: memref<8x128xf32, #tpu.memory_space<vmem>>, %arg3: memref<128x128xf32, #tpu.memory_space<vmem>>, %arg4: memref<1x8x128xf32, #tpu.memory_space<vmem>>) attributes {dimension_semantics = [#tpu.dimension_semantics<parallel>], iteration_bounds = array<i64: 4>, scalar_prefetch = 0 : i64, scratch_operands = 0 : i64, tpu.core_type = #tpu.core_type<tc>, window_params = [{transform_indices = @transform_0, window_bounds = array<i64: 8, 1>}, {transform_indices = @transform_1, window_bounds = array<i64: 8, 128>}, {pipeline_mode = #tpu.pipeline_mode<synchronous>, transform_indices = @transform_2, window_bounds = array<i64: 128, 128>}, {transform_indices = @transform_3, window_bounds = array<i64: 1, 8, 128>}]} {
    %c0 = arith.constant 0 : index
    %c0_0 = arith.constant 0 : index
    %0 = vector.load %arg2[%c0, %c0_0] : memref<8x128xf32, #tpu.memory_space<vmem>>, vector<8x128xf32>
    %1 = tpu.iota {dimensions = array<i32: 1>} : vector<8x128xi32>
    %c0_1 = arith.constant 0 : index
    %c0_2 = arith.constant 0 : index
    %2 = vector.load %arg1[%c0_1, %c0_2] : memref<8x1xi32, #tpu.memory_space<vmem>>, vector<8x1xi32>
    %3 = vector.broadcast %2 : vector<8x1xi32> to vector<8x128xi32>
    %4 = arith.cmpi eq, %1, %3 : vector<8x128xi32>
    %5 = arith.extui %4 : vector<8x128xi1> to vector<8x128xi32>
    %6 = arith.sitofp %5 : vector<8x128xi32> to vector<8x128xf32>
    %c0_3 = arith.constant 0 : index
    %c0_4 = arith.constant 0 : index
    %7 = vector.load %arg3[%c0_3, %c0_4] : memref<128x128xf32, #tpu.memory_space<vmem>>, vector<128x128xf32>
    %cst = arith.constant dense<0.000000e+00> : vector<8x128xf32>
    %8 = tpu.matmul %6, %7, %cst {dimension_numbers = #tpu.dot_dimension_numbers<[1], [0], [0], [1], [0, 0, 1, 1], [], []>} : vector<8x128xf32>, vector<128x128xf32>, vector<8x128xf32> -> vector<8x128xf32>
    %cst_5 = arith.constant dense<0xFF800000> : vector<8xf32>
    %9 = vector.multi_reduction <maximumf>, %0, %cst_5 [1] : vector<8x128xf32> to vector<8xf32>
    %10 = vector.shape_cast %9 : vector<8xf32> to vector<8x1xf32>
    %11 = vector.broadcast %10 : vector<8x1xf32> to vector<8x128xf32>
    %12 = arith.subf %0, %11 : vector<8x128xf32>
    %13 = math.exp %12 : vector<8x128xf32>
    %cst_6 = arith.constant dense<0.000000e+00> : vector<8xf32>
    %14 = vector.multi_reduction <add>, %13, %cst_6 [1] : vector<8x128xf32> to vector<8xf32>
    %15 = vector.shape_cast %14 : vector<8xf32> to vector<8x1xf32>
    %16 = math.log %15 : vector<8x1xf32>
    %17 = arith.addf %16, %10 : vector<8x1xf32>
    %18 = vector.broadcast %17 : vector<8x1xf32> to vector<8x128xf32>
    %19 = arith.subf %18, %0 : vector<8x128xf32>
    %20 = arith.mulf %8, %19 : vector<8x128xf32>
    %21 = vector.shape_cast %20 : vector<8x128xf32> to vector<1x8x128xf32>
    %cst_7 = arith.constant dense<0.000000e+00> : vector<1xf32>
    %22 = vector.multi_reduction <add>, %21, %cst_7 [1, 2] : vector<1x8x128xf32> to vector<1xf32>
    %23 = vector.shape_cast %22 : vector<1xf32> to vector<1x1x1xf32>
    %24 = vector.extract %23[0, 0, 0] : f32 from vector<1x1x1xf32>
    %25 = vector.broadcast %24 : f32 to vector<1x8x128xf32>
    %c0_8 = arith.constant 0 : index
    %c0_9 = arith.constant 0 : index
    %c0_10 = arith.constant 0 : index
    %26 = vector.load %arg4[%c0_8, %c0_9, %c0_10] : memref<1x8x128xf32, #tpu.memory_space<vmem>>, vector<1x8x128xf32>
    tpu.vector_store %arg4[%c0_8, %c0_9, %c0_10], %25 {strides = array<i32>} : memref<1x8x128xf32, #tpu.memory_space<vmem>>, vector<1x8x128xf32>,
    return
  }
  func.func @transform_0(%arg0: i32) -> (i32, i32) {
    %c0_i32 = arith.constant 0 : i32
    %c0_i32_0 = arith.constant 0 : i32
    return %arg0, %c0_i32 : i32, i32
  }
  func.func @transform_1(%arg0: i32) -> (i32, i32) {
    %c0_i32 = arith.constant 0 : i32
    %c0_i32_0 = arith.constant 0 : i32
    return %arg0, %c0_i32 : i32, i32
  }
  func.func @transform_2(%arg0: i32) -> (i32, i32) {
    %c0_i32 = arith.constant 0 : i32
    %c0_i32_0 = arith.constant 0 : i32
    %c0_i32_1 = arith.constant 0 : i32
    return %c0_i32, %c0_i32_0 : i32, i32
  }
  func.func @transform_3(%arg0: i32) -> (i32, i32, i32) {
    %c0_i32 = arith.constant 0 : i32
    %c0_i32_0 = arith.constant 0 : i32
    %c0_i32_1 = arith.constant 0 : i32
    return %arg0, %c0_i32, %c0_i32_0 : i32, i32, i32
  }
}

</mosaic_0001>

<bundles_post_ra>
// kernel: tpu_custom_call.1
= control target key start
LH: loop header
LB: loop body
LE: loop exit
PB: predicated region body
PF: predicated region fallthrough
CT: control target
= control target key end

     0   :  { %8 = vsyncpa [#allocation3], 0  ;;  %s785_s0 = inlined_call_operand.vmem [shape: s32[32,1], index: 0, kind: input, shape index: {}]   ;;  %s786_s1 = inlined_call_operand.vmem [shape: f32[32,128], index: 1, kind: input, shape index: {}]   ;;  %s787_s2 = inlined_call_operand.hbm [shape: f32[128,128], index: 2, kind: input, shape index: {}]   ;;  %s788_s3 = inlined_call_operand.hbm [shape: f32[4,8,128], index: 3, kind: output, shape index: {}]  }
   0x1   :  { %9 = vsyncpa [#allocation4], 0 }
   0x2   :  { %11 = vsyncpa [#allocation4 + $0x1], 0  ;;  %s664_s12 = smov 0   ;;  %s666_s13 = smov 0  }
   0x3   :  { %s668_s14 = smov 0   ;;  %s670_s15 = smov 0  }
   0x4 LB: > { %s685_s16 = sadd.s32 4294967295, %s634_s15   ;;  %s414_s17 = sadd.s32 4294967294, %s634_s15   ;;  %s634_s15 = sphi %s670_s15, %s796_s15   ;;  %s630_s14 = sphi %s668_s14, %s795_s14   ;;  %s626_s13 = sphi %s666_s13, %s794_s13   ;;  %s622_s12 = sphi %s664_s12, %s793_s12  }
   0x5   : > { %s689_s18 = sadd.s32 1, %s634_s15   ;;  %s97_s19 = sadd.s32 1, %s630_s14 }
   0x6   : > { %s94_s20 = ssub.s32 %s634_s15, %s689_s18  ;;  %p107_p0 = scmp.ne.s32.totalorder %s630_s14, %s626_s13 }
   0x7   : > { %p95_p1 = scmp.eq.s32.totalorder %s94_s20, 0  ;;  %p108_p2 = scmp.eq.s32.totalorder %s685_s16, 3 }
   0x8   : > { %p113_p3 = scmp.ne.s32.totalorder %s626_s13, %s622_s12  ;;  %p114_p4 = scmp.eq.s32.totalorder %s414_s17, 3 }
   0x9   : > { %s700_s21 = scalar_select %p95_p1, %s630_s14, %s97_s19  }
   0xa   : > { %p702_p5 = por %p108_p2, %p107_p0  ;;  %p706_p6 = por %p114_p4, %p113_p3 }
   0xb   : > { %p415_p7 = scmp.ge.s32.totalorder %s634_s15, 1  ;;  %p121_p8 = scmp.lt.s32.totalorder %s634_s15, 5 }
   0xc   : > { %s790_s23 = scalar_select %p706_p6, 1, 0 }
   0xd   : > { %p497_p9 = scmp.eq.s32.totalorder %s685_s16, 0  ;;  %p713_p10 = pnand %p415_p7, %p121_p8 }
   0xe   : > { %s636_s25 = smov [#allocation2]  }
   0xf   : > { %s133_s26 = sshll.u32 %s636_s25, 4  ;;  %p489_p11 = pneg %p713_p10  ;;  %s134_s26 = int_to_ptr.vmem [resolvable:$true] %s133_s26 }
  0x10   : > { %s555_s27 = scalar_lea.vmem %s134_s26, 2048  ;;  %p563_p3 = scmp.lt.s32.totalorder %s134_s26, %s134_s26 }
  0x11   : > { %p490_p12 = pnand %p497_p9, %p489_p11  ;;  %p556_p0 = scmp.ne.s32.totalorder %s134_s26, %s555_s27 }
  0x12   : > { %p564_p4 = scmp.lt.s32.totalorder %s555_s27, %s555_s27 }
  0x13   : > { %p546_p13 = pneg %p490_p12 }
  0x14   : > { %p565_p6 = por %p564_p4, %p563_p3 }
  0x15   : > { %p558_p1 = pnand %p556_p0, %p546_p13 }
  0x17   : > { %p559_p2 = pneg %p558_p1 }
  0x19   : > { %p566_p7 = pnand %p565_p6, %p559_p2 }
  0x1b   : > { %569 = shalt.err (!%p566_p7)
}
  0x1c   : > { %s637_s28 = smov 128   ;;  %s638_s29 = smov 8  }
  0x1d   : > { %492 = dma.hbm_to_vmem [thread:$0]  (!%p490_p12), %s787_s2, 2048, %s134_s26, [#allocation3], %s637_s28, %s637_s28, %s638_s29  }
  0x1e   : > { %163 = sbr.rel (%p713_p10) target bundleno = 604 (0x25c), region = 32 }
  0x23   : > { %613 = dma.done.wait (%p497_p9), [#allocation3], 2048  }
  0x24   : > { %615 = vsyncadd (%p497_p9), [#allocation3], 4294965248  ;;  %p190_p8 = scmp.lt.s32.totalorder %s685_s16, 3  ;;  %v639_v0 = vmov 0   ;;  %v640_v1 = vmov 0.0   ;;  %vm641_vm0 = vmmov 0   ;;  %v199_v20 = vlaneseq }
  0x25   : > { %539 = vset.pattern.permute.xlu0 %v639_v0  ;;  %446 = vmatprep.subr.mxu0 %v640_v1  ;;  %v223_v3 = vld [vmem:[#allocation2 + $0x78] sm:$0xff]  ;;  %v222_v4 = vld [vmem:[#allocation2 + $0x70] sm:$0xff]  ;;  %v221_v5 = vld [vmem:[#allocation2 + $0x68] sm:$0xff]  ;;  %v642_v23 = vmov 1.0   ;;  %s187_s19 = sand.u32 1, %s626_s13   ;;  %s426_s26 = sshll.u32 %s685_s16, 7 }
  0x26   : > { %s732_s5 = scalar_select %p190_p8, %s685_s16, 3  ;;  %478 = vmatprep.mubr.msk.f32.mxu0 %vm641_vm0, %v640_v1  ;;  %447 = vmatpush3.msra.mxu0 %v223_v3  ;;  %v220_v6 = vld [vmem:[#allocation2 + $0x60] sm:$0xff]  ;;  %v219_v7 = vld [vmem:[#allocation2 + $0x58] sm:$0xff]  ;;  %v218_v8 = vld [vmem:[#allocation2 + $0x50] sm:$0xff]  ;;  %v200_v21 = vand.u32 127, %v199_v20 }
  0x27   : > { %448 = vmatprep.subr.mxu0 %v640_v1  ;;  %v217_v9 = vld [vmem:[#allocation2 + $0x48] sm:$0xff]  ;;  %v216_v10 = vld [vmem:[#allocation2 + $0x40] sm:$0xff]  ;;  %v215_v11 = vld [vmem:[#allocation2 + $0x38] sm:$0xff]  ;;  %s420_s20 = sshll.u32 %s187_s19, 3  ;;  %s329_s30 = scalar_lea.hbm %s788_s3, %s426_s26 }
  0x28   : > { %s421_s6 = sshll.u32 %s732_s5, 3  ;;  %449 = vmatpush3.msra.mxu0 %v222_v4  ;;  %v214_v12 = vld [vmem:[#allocation2 + $0x30] sm:$0xff]  ;;  %v213_v13 = vld [vmem:[#allocation2 + $0x28] sm:$0xff]  ;;  %v212_v14 = vld [vmem:[#allocation2 + $0x20] sm:$0xff]  ;;  %s189_s24 = scalar_lea.vmem [#allocation5], %s420_s20 }
  0x29   : > { %s193_s9 = scalar_lea.vmem %s785_s0, %s421_s6  ;;  %450 = vmatprep.subr.mxu0 %v640_v1  ;;  %v211_v15 = vld [vmem:[#allocation2 + $0x18] sm:$0xff]  ;;  %v210_v16 = vld [vmem:[#allocation2 + $0x10] sm:$0xff]  ;;  %s197_s17 = scalar_lea.vmem %s786_s1, %s421_s6  ;;  %v209_v17 = vld [vmem:[#allocation2 + $0x8] sm:$0xff] }
  0x2a   : > { %v201_v2 = vld [vmem:[%s193_s9] sm:$0xff]  ;;  %451 = vmatpush3.msra.mxu0 %v221_v5  ;;  %s331_s25 = sshll.u32 %s189_s24, 4  ;;  %s318_s4 = scalar_lea.sflag [#allocation4], %s187_s19  ;;  %s747_s25 = int_to_ptr.vmem [resolvable:$true] %s331_s25 }
  0x2b   : > { %203 = vperm.xlu0 %539, %v201_v2   ;;  %452 = vmatprep.subr.mxu0 %v640_v1  ;;  %v208_v18 = vld [vmem:[#allocation2] sm:$0xff]  ;;  %s570_s5 = scalar_lea.vmem %s747_s25, 128  ;;  %s643_s6 = smov [#allocation5]  }
  0x2c   : > { %453 = vmatpush3.msra.mxu0 %v220_v6  ;;  %v198_v19 = vld [vmem:[%s197_s17] sm:$0xff]  ;;  %p571_p6 = scmp.ne.s32.totalorder %s747_s25, %s570_s5  ;;  %s574_s16 = sshll.u32 %s643_s6, 4  ;;  %s575_s16 = int_to_ptr.vmem [resolvable:$false] %s574_s16 }
  0x2d   : > { %454 = vmatprep.subr.mxu0 %v640_v1  ;;  %s576_s7 = scalar_lea.vmem %s575_s16, 256  ;;  %p577_p11 = scmp.lt.s32.totalorder %s747_s25, %s575_s16 }
  0x2e   : > { %455 = vmatpush3.msra.mxu0 %v219_v7  ;;  %p572_p9 = pnand %p571_p6, %p702_p5  ;;  %p578_p12 = scmp.lt.s32.totalorder %s576_s7, %s570_s5 }
  0x2f   : > { %456 = vmatprep.subr.mxu0 %v640_v1 }
  0x30   : > { %457 = vmatpush3.msra.mxu0 %v218_v8  ;;  %p573_p10 = pneg %p572_p9  ;;  %p579_p13 = por %p578_p12, %p577_p11 }
  0x31   : > { %458 = vmatprep.subr.mxu0 %v640_v1 }
  0x32   : > { %459 = vmatpush3.msra.mxu0 %v217_v9  ;;  %p580_p0 = pnand %p579_p13, %p573_p10 }
  0x33   : > { %460 = vmatprep.subr.mxu0 %v640_v1 }
  0x34   : > { %461 = vmatpush3.msra.mxu0 %v216_v10 }
  0x35   : > { %462 = vmatprep.subr.mxu0 %v640_v1 }
  0x36   : > { %463 = vmatpush3.msra.mxu0 %v215_v11 }
  0x37   : > { %464 = vmatprep.subr.mxu0 %v640_v1 }
  0x38   : > { %465 = vmatpush3.msra.mxu0 %v214_v12 }
  0x39   : > { %466 = vmatprep.subr.mxu0 %v640_v1 }
  0x3a   : > { %467 = vmatpush3.msra.mxu0 %v213_v13 }
  0x3b   : > { %468 = vmatprep.subr.mxu0 %v640_v1 }
  0x3c   : > { %469 = vmatpush3.msra.mxu0 %v212_v14 }
  0x3d   : > { %470 = vmatprep.subr.mxu0 %v640_v1 }
  0x3e   : > { %471 = vmatpush3.msra.mxu0 %v211_v15 }
  0x3f   : > { %472 = vmatprep.subr.mxu0 %v640_v1 }
  0x40   : > { %473 = vmatpush3.msra.mxu0 %v210_v16 }
  0x41   : > { %474 = vmatprep.subr.mxu0 %v640_v1 }
  0x42   : > { %475 = vmatpush3.msra.mxu0 %v209_v17 }
  0x43   : > { %476 = vmatprep.subr.mxu0 %v640_v1 }
  0x44   : > { %477 = vmatpush3.msra.mxu0 %v208_v18 }
  0x4a   : > { %294 = vmax.xlane.f32.xlu0 %v198_v19 }
  0xa6   : > { %v204_v22 = vpop.permute.xlu0 %203 }
  0xa7   : > { %vm205_vm1 = vcmp.eq.s32.totalorder %v200_v21, %v204_v22 }
  0xa8   : > { %479 = vmatmul.mubr.msk.f32.vlgmr.msra.gmra.mxu0 %vm205_vm1, %v642_v23 }
  0xd3   : > { %v295_v24 = vpop.xlane.xlu0 %294 }
  0xd4   : > { %v296_v25 = vsub.f32 %v198_v19, %v295_v24 }
  0xd6   : > { %v297_v26 = vmul.f32 1.442695, %v296_v25 }
  0xd8   : > { %540 = vpow2.f32 %v297_v26 }
  0xe5   : > { %v541_v27 = vpop.eup %540 }
  0xe6   : > { %299 = vadd.xlane.f32.xlu1 %v541_v27 }
 0x168   : > { %v290_v28 = vpop.f32.mrf.mxu0 }
 0x16a   : > { %v480_v29 = vpop.f32.mrf.mxu0 }
 0x16f   : > { %v300_v30 = vpop.xlane.xlu1 %299 }
 0x170   : > { %542 = vlog2.f32 %v300_v30 }
 0x17d   : > { %v543_v31 = vpop.eup %542 }
 0x17e   : > { %v302_v32 = vmul.f32 0.6931472, %v543_v31 }
 0x180   : > { %v303_v33 = vadd.f32 %v302_v32, %v295_v24 }
 0x182   : > { %v304_v34 = vsub.f32 %v303_v33, %v198_v19 }
 0x184   : > { %v305_v35 = vmul.f32 %v304_v34, %v290_v28 }
 0x186   : > { %306 = vadd.xlane.f32.xlu1 %v305_v35 }
 0x20f   : > { %v307_v36 = vpop.xlane.xlu1 %306 }
 0x210   : > { %v308_v37 = vrot.slane %v307_v36, 4 }
 0x212   : > { %v309_v38 = vadd.f32 %v308_v37, %v307_v36 }
 0x214   : > { %v310_v39 = vrot.slane %v309_v38, 2 }
 0x216   : > { %v311_v40 = vadd.f32 %v310_v39, %v309_v38 }
 0x218   : > { %v312_v41 = vrot.slane %v311_v40, 1 }
 0x21a   : > { %v313_v42 = vadd.f32 %v312_v41, %v311_v40 }
 0x21c   : > { %481 = vpush %v313_v42 }
 0x24d   : > { %s482_s27 = spop %481 }
 0x24e   : > { %v315_v43 = vstv %s482_s27 }
 0x24f   : > { %316 = vst [vmem:[%s189_s24] sm:$0xff] %v315_v43 }
 0x250   : > { %583 = shalt.err (!%p580_p0)
}
 0x251   : > { %s584_s8 = scalar_lea.hbm %s329_s30, 128  ;;  %s588_s11 = scalar_lea.hbm %s788_s3, 512 }
 0x252   : > { %p585_p1 = scmp.ne.s32.totalorder %s329_s30, %s584_s8  ;;  %p589_p4 = scmp.lt.s32.totalorder %s329_s30, %s788_s3 }
 0x253   : > { %p590_p7 = scmp.lt.s32.totalorder %s588_s11, %s584_s8 }
 0x254   : > { %p586_p2 = pnand %p585_p1, %p702_p5 }
 0x255   : > { %p591_p8 = por %p590_p7, %p589_p4 }
 0x256   : > { %p587_p3 = pneg %p586_p2 }
 0x258   : > { %p592_p6 = pnand %p591_p8, %p587_p3 }
 0x25a   : > { %595 = shalt.err (!%p592_p6)
}
 0x25b   : > { %487 = dma.vmem_to_hbm [thread:$0]  (%p702_p5), %s747_s25, 128, %s329_s30, %s318_s4  }
 0x25c PF: > { %p499_p9 = scmp.ge.s32.totalorder %s634_s15, 2  ;;  %s343_s20 = sand.u32 1, %s622_s12  }
 0x25d   : > { %p792_p10 = scmp.ne.s32.totalorder %s790_s23, 0  ;;  %s344_s24 = scalar_lea.sflag [#allocation4], %s343_s20 }
 0x25f   : > { %p494_p11 = pnand %p499_p9, %p792_p10 }
 0x261   : > { %p495_p12 = pneg %p494_p11 }
 0x263   : > { %617 = dma.done.wait (%p495_p12), %s344_s24, 128  }
 0x264   : > { %619 = vsyncadd (%p495_p12), %s344_s24, 4294967168  ;;  %p14_p13 = scmp.ge.s32.totalorder %s689_s18, 6   ;;  %s793_s12 = smov %s626_s13 }
 0x265   : > { %s794_s13 = smov %s630_s14  ;;  %s795_s14 = smov %s700_s21 }
 0x266   : > { %s796_s15 = smov %s689_s18  ;;  %16 = sbr.rel (!%p14_p13) target bundleno = 4 (0x4), region = 75 }
 0x26b   :  { %349 = vsyncpa [#allocation3], 1 }
 0x26c   :  { %351 = vsyncpa [#allocation3 + $0x1], 1 }
 0x26d   :  { %352 = vsyncpa [#allocation4], 1 }
 0x26e   :  { %354 = vsyncpa [#allocation4 + $0x1], 1 }

</bundles_post_ra>
